<compile_context>
chip_gen: v7x
topology: tpu7x:2x2x1
jax: 0.10.0
libtpu: 0.0.40
codegen_flags: <defaults>
</compile_context>

<pallas_src>
import jax
import jax.numpy as jnp
from jax.experimental import pallas as pl
from jax.experimental.pallas import tpu as pltpu


# ------------------------------ tiling helper ---------------------------------
def _pick_tile(dim, target, align):
    """Largest tile <= target that divides dim and is a multiple of align.
    Falls back to the full dim (always a valid single tile)."""
    if dim <= target:
        return dim
    t = (target // align) * align
    while t >= align:
        if dim % t == 0:
            return t
        t -= align
    return dim


# ------------------------------- gate kernel -----------------------------------
def _gate_kernel(x_ref, wg_ref, bg_ref, probs_ref):
    logits = jnp.dot(x_ref[...], wg_ref[...],
                     preferred_element_type=jnp.float32) + bg_ref[...]
    m = jnp.max(logits, axis=-1, keepdims=True)
    ex = jnp.exp(logits - m)
    denom = jnp.sum(ex, axis=-1, keepdims=True)
    probs_ref[...] = ex * pl.reciprocal(denom, approx=True)


def gate_probs(x, wg, bg):
    N, D = x.shape
    E = wg.shape[1]
    # Pad the expert axis to a lane-dense multiple of 128: padded logits get a
    # very negative bias so their softmax weight underflows to exactly 0, and
    # the output block is stored with full (unmasked) vector stores.
    Ep = max(128, ((E + 127) // 128) * 128)
    if Ep != E:
        wg = jnp.concatenate([wg, jnp.zeros((D, Ep - E), jnp.float32)], axis=1)
        bg = jnp.concatenate([bg, jnp.full((1, Ep - E), -1e30, jnp.float32)], axis=1)
    tn = _pick_tile(N, 512, 8)
    probs = pl.pallas_call(
        _gate_kernel,
        out_shape=jax.ShapeDtypeStruct((N, Ep), jnp.float32),
        grid=(N // tn,),
        in_specs=[
            pl.BlockSpec((tn, D), lambda i: (i, 0)),
            pl.BlockSpec((D, Ep), lambda i: (0, 0)),
            pl.BlockSpec((1, Ep), lambda i: (0, 0)),
        ],
        out_specs=pl.BlockSpec((tn, Ep), lambda i: (i, 0)),
        compiler_params=pltpu.CompilerParams(
            dimension_semantics=("parallel",),
            vmem_limit_bytes=48 * 1024 * 1024),
    )(x, wg, bg)
    return probs[:, :E]


# ------------------------------ expert kernel ----------------------------------
def _expert_kernel(x_ref, w_ref, b_ref, gs_ref, out_ref, kl_ref, u_ref,
                   acc_ref, kl_acc_ref, u_acc_ref):
    j = pl.program_id(1)          # output-feature tile
    e = pl.program_id(2)          # expert (innermost reduction axis)
    nj = pl.num_programs(1)
    ne = pl.num_programs(2)

    @pl.when(e == 0)
    def _():
        acc_ref[...] = jnp.zeros_like(acc_ref)

    @pl.when(jnp.logical_and(j == 0, e == 0))
    def _():
        kl_acc_ref[...] = jnp.zeros_like(kl_acc_ref)
        u_acc_ref[...] = jnp.zeros_like(u_acc_ref)

    # Fused (mu | logvar) matmul: a single MXU pass over x per expert/out-tile.
    fused = jnp.dot(x_ref[...], w_ref[...],
                    preferred_element_type=jnp.float32) + b_ref[...]
    tdn = fused.shape[-1] // 2
    mu = fused[:, :tdn]
    logvar = fused[:, tdn:]
    sigma = jnp.exp(logvar)                     # expert "uncertainty"

    # TODO(synk): torch reparameterise() draws randn eps for z, but z is never
    # used in the forward outputs, so it is intentionally skipped here.

    g_col = gs_ref[...]                         # (tn, 1) gate column for expert e

    # Gate-weighted combine into the f32 accumulator.
    acc_ref[...] += g_col * mu

    # KL partial: sum over this (token-tile, feature-tile) of -(1+lv-mu^2-sig)/2.
    kl_acc_ref[...] += jnp.sum(-(1.0 + logvar - mu * mu - sigma) * 0.5)
    # Uncertainty partial: sum_n (sum_d sigma) * gate[n, e].
    u_acc_ref[...] += jnp.sum(jnp.sum(sigma, axis=1, keepdims=True) * g_col)

    @pl.when(e == ne - 1)
    def _():
        out_ref[...] = acc_ref[...]

    @pl.when(jnp.logical_and(j == nj - 1, e == ne - 1))
    def _():
        kl_ref[...] = kl_acc_ref[...]
        u_ref[...] = u_acc_ref[...]


def experts_combine(x, wmu, bmu, wlv, blv, gate_scores,
                    tn_target=256, tdn_target=256):
    N, D = x.shape
    E = wmu.shape[0]

    tn = _pick_tile(N, tn_target, 8)       # token tile (parallel grid axis)
    tdn = _pick_tile(D, tdn_target, 128)   # output-feature tile
    ni, nj = N // tn, D // tdn

    # Fuse (mu | logvar) weights along the output axis, interleaved per output
    # tile so each (D, 2*tdn) weight block holds [mu tile j | logvar tile j].
    wf = jnp.concatenate([wmu.reshape(E, D, nj, tdn),
                          wlv.reshape(E, D, nj, tdn)], axis=-1).reshape(E, D, 2 * D)
    bf = jnp.concatenate([bmu.reshape(E, 1, nj, tdn),
                          blv.reshape(E, 1, nj, tdn)], axis=-1).reshape(E, 1, 2 * D)

    # Gate scores as [E, N, 1] so each expert's column is a free BlockSpec slice.
    gs_t = jnp.transpose(gate_scores)[:, :, None]

    out_shape = (
        jax.ShapeDtypeStruct((N, D), jnp.float32),        # moe_output
        jax.ShapeDtypeStruct((ni, 1, 128), jnp.float32),  # per-token-tile KL partials
        jax.ShapeDtypeStruct((ni, 1, 128), jnp.float32),  # per-token-tile uncertainty partials
    )
    moe_out, kl_part, u_part = pl.pallas_call(
        _expert_kernel,
        out_shape=out_shape,
        grid=(ni, nj, E),
        in_specs=[
            pl.BlockSpec((tn, D), lambda i, j, e: (i, 0)),
            pl.BlockSpec((None, D, 2 * tdn), lambda i, j, e: (e, 0, j)),
            pl.BlockSpec((None, 1, 2 * tdn), lambda i, j, e: (e, 0, j)),
            pl.BlockSpec((None, tn, 1), lambda i, j, e: (e, i, 0)),
        ],
        out_specs=(
            pl.BlockSpec((tn, tdn), lambda i, j, e: (i, j)),
            pl.BlockSpec((None, 1, 128), lambda i, j, e: (i, 0, 0)),
            pl.BlockSpec((None, 1, 128), lambda i, j, e: (i, 0, 0)),
        ),
        scratch_shapes=[
            pltpu.VMEM((tn, tdn), jnp.float32),   # combine accumulator
            pltpu.VMEM((1, 128), jnp.float32),    # KL accumulator
            pltpu.VMEM((1, 128), jnp.float32),    # uncertainty accumulator
        ],
        compiler_params=pltpu.CompilerParams(
            dimension_semantics=("parallel", "arbitrary", "arbitrary"),
            vmem_limit_bytes=48 * 1024 * 1024),
    )(x, wf, bf, gs_t)

    kl_sum = jnp.sum(kl_part[:, 0, 0])   # sum over {experts, tokens, dims}
    u_sum = jnp.sum(u_part[:, 0, 0])     # sum over {experts, tokens, dims} of sigma*gate
    return moe_out, kl_sum, u_sum


# -------------------------------- MoE forward ----------------------------------
def moe_forward(x, params, num_experts, capacity_factor=1.0, epsilon=1e-6,
                use_aux_loss=True):
    N, D = x.shape
    E = num_experts

    # Gate: softmax(x @ Wg + bg) in Pallas.
    probs = gate_probs(x, params["wg"], params["bg"])           # [N, E]

    # Top-3 routing mask + capacity normalization (tiny glue, plain JAX).
    capacity = int(capacity_factor * N)
    _, top_idx = jax.lax.top_k(probs, 3)                        # [N, 3]
    mask = jnp.zeros_like(probs).at[jnp.arange(N)[:, None], top_idx].set(1.0)
    masked = probs * mask
    denom = jnp.sum(masked, axis=0, keepdims=True) + epsilon
    gate_scores = masked / denom * capacity

    if use_aux_loss:
        density = jnp.mean(mask, axis=0)
        density_proxy = jnp.mean(probs, axis=0)
        loss = jnp.mean(density_proxy * density) * (E ** 2)
    else:
        loss = jnp.float32(0.0)

    # torch forward scrubs NaNs from gate_scores at runtime.
    gate_scores = jnp.where(jnp.isnan(gate_scores), 0.0, gate_scores)
    # TODO(synk): runtime NaN scrub of stacked expert outputs + the data-dependent
    # print are not replicated inside the kernel (no NaNs arise with finite inputs).

    # Experts + weighted combine + loss reductions in Pallas.
    moe_out, kl_sum, u_sum = experts_combine(
        x, params["wmu"], params["bmu"], params["wlv"], params["blv"], gate_scores)

    loss = loss + kl_sum / (N * E)   # sum_e [mean_n sum_d KL] / num_experts
    loss = loss + u_sum / N          # (Uncertainty * gate_scores).sum(1).mean()
    return moe_out, loss


# ----------------------------------- main ---------------------------------------
if __name__ == "__main__":
    N, D, E = 8, 32, 8                       # tokens, feature dim, num_experts
    key = jax.random.PRNGKey(0)
    ks = jax.random.split(key, 7)

    x = jax.random.normal(ks[0], (N, D), jnp.float32)
    params = dict(
        wg=jax.random.normal(ks[1], (D, E), jnp.float32) * 0.1,
        bg=jax.random.normal(ks[2], (1, E), jnp.float32) * 0.1,
        wmu=jax.random.normal(ks[3], (E, D, D), jnp.float32) * 0.1,
        bmu=jax.random.normal(ks[4], (E, 1, D), jnp.float32) * 0.1,
        wlv=jax.random.normal(ks[5], (E, D, D), jnp.float32) * 0.1,
        blv=jax.random.normal(ks[6], (E, 1, D), jnp.float32) * 0.1,
    )

    moe_out, loss = moe_forward(x, params, num_experts=E)
    jax.block_until_ready((moe_out, loss))
    assert moe_out.shape == (N, D) and loss.shape == ()
    print("KERNEL_OK")
</pallas_src>

<mosaic_0001>
module attributes {stable_mosaic.version = 11 : i64} {
  func.func @_gate_kernel(%arg0: i32, %arg1: memref<8x32xf32, #tpu.memory_space<vmem>>, %arg2: memref<32x128xf32, #tpu.memory_space<vmem>>, %arg3: memref<1x128xf32, #tpu.memory_space<vmem>>, %arg4: memref<8x128xf32, #tpu.memory_space<vmem>>) attributes {dimension_semantics = [#tpu.dimension_semantics<parallel>], iteration_bounds = array<i64: 1>, scalar_prefetch = 0 : i64, scratch_operands = 0 : i64, tpu.core_type = #tpu.core_type<tc>, window_params = [{transform_indices = @transform_0, window_bounds = array<i64: 8, 32>}, {pipeline_mode = #tpu.pipeline_mode<synchronous>, transform_indices = @transform_1, window_bounds = array<i64: 32, 128>}, {pipeline_mode = #tpu.pipeline_mode<synchronous>, transform_indices = @transform_2, window_bounds = array<i64: 1, 128>}, {transform_indices = @transform_3, window_bounds = array<i64: 8, 128>}]} {
    %c0 = arith.constant 0 : index
    %c0_0 = arith.constant 0 : index
    %0 = vector.load %arg1[%c0, %c0_0] : memref<8x32xf32, #tpu.memory_space<vmem>>, vector<8x32xf32>
    %c0_1 = arith.constant 0 : index
    %c0_2 = arith.constant 0 : index
    %1 = vector.load %arg2[%c0_1, %c0_2] : memref<32x128xf32, #tpu.memory_space<vmem>>, vector<32x128xf32>
    %cst = arith.constant dense<0.000000e+00> : vector<8x128xf32>
    %2 = tpu.matmul %0, %1, %cst {dimension_numbers = #tpu.dot_dimension_numbers<[1], [0], [0], [1], [0, 0, 1, 1], [], []>} : vector<8x32xf32>, vector<32x128xf32>, vector<8x128xf32> -> vector<8x128xf32>
    %c0_3 = arith.constant 0 : index
    %c0_4 = arith.constant 0 : index
    %3 = vector.load %arg3[%c0_3, %c0_4] : memref<1x128xf32, #tpu.memory_space<vmem>>, vector<1x128xf32>
    %4 = vector.broadcast %3 : vector<1x128xf32> to vector<8x128xf32>
    %5 = arith.addf %2, %4 : vector<8x128xf32>
    %cst_5 = arith.constant dense<0xFF800000> : vector<8xf32>
    %6 = vector.multi_reduction <maximumf>, %5, %cst_5 [1] : vector<8x128xf32> to vector<8xf32>
    %7 = vector.shape_cast %6 : vector<8xf32> to vector<8x1xf32>
    %8 = vector.broadcast %7 : vector<8x1xf32> to vector<8x128xf32>
    %9 = arith.subf %5, %8 : vector<8x128xf32>
    %10 = math.exp %9 : vector<8x128xf32>
    %cst_6 = arith.constant dense<0.000000e+00> : vector<8xf32>
    %11 = vector.multi_reduction <add>, %10, %cst_6 [1] : vector<8x128xf32> to vector<8xf32>
    %12 = vector.shape_cast %11 : vector<8xf32> to vector<8x1xf32>
    %13 = tpu.reciprocal %12 {approx = true} : vector<8x1xf32> -> vector<8x1xf32>
    %14 = vector.broadcast %13 : vector<8x1xf32> to vector<8x128xf32>
    %15 = arith.mulf %10, %14 : vector<8x128xf32>
    %c0_7 = arith.constant 0 : index
    %c0_8 = arith.constant 0 : index
    %16 = vector.load %arg4[%c0_7, %c0_8] : memref<8x128xf32, #tpu.memory_space<vmem>>, vector<8x128xf32>
    tpu.vector_store %arg4[%c0_7, %c0_8], %15 {strides = array<i32>} : memref<8x128xf32, #tpu.memory_space<vmem>>, vector<8x128xf32>,
    return
  }
  func.func @transform_0(%arg0: i32) -> (i32, i32) {
    %c0_i32 = arith.constant 0 : i32
    %c0_i32_0 = arith.constant 0 : i32
    return %arg0, %c0_i32 : i32, i32
  }
  func.func @transform_1(%arg0: i32) -> (i32, i32) {
    %c0_i32 = arith.constant 0 : i32
    %c0_i32_0 = arith.constant 0 : i32
    %c0_i32_1 = arith.constant 0 : i32
    return %c0_i32, %c0_i32_0 : i32, i32
  }
  func.func @transform_2(%arg0: i32) -> (i32, i32) {
    %c0_i32 = arith.constant 0 : i32
    %c0_i32_0 = arith.constant 0 : i32
    %c0_i32_1 = arith.constant 0 : i32
    return %c0_i32, %c0_i32_0 : i32, i32
  }
  func.func @transform_3(%arg0: i32) -> (i32, i32) {
    %c0_i32 = arith.constant 0 : i32
    %c0_i32_0 = arith.constant 0 : i32
    return %arg0, %c0_i32 : i32, i32
  }
}

</mosaic_0001>

<bundles_post_ra>
// kernel: tpu_custom_call.1
= control target key start
LH: loop header
LB: loop body
LE: loop exit
PB: predicated region body
PF: predicated region fallthrough
CT: control target
= control target key end

     0   :  { %8 = vsyncpa [#allocation3], 0  ;;  %s335_s0 = inlined_call_operand.hbm [shape: f32[8,32], index: 0, kind: input, shape index: {}]   ;;  %s336_s1 = inlined_call_operand.hbm [shape: f32[32,128], index: 1, kind: input, shape index: {}]   ;;  %s337_s2 = inlined_call_operand.vmem [shape: f32[1,128], index: 2, kind: input, shape index: {}]   ;;  %s338_s3 = inlined_call_operand.hbm [shape: f32[8,128], index: 3, kind: output, shape index: {}]  }
   0x1   :  { %9 = vsyncpa [#allocation6], 0 }
   0x2   :  { %10 = vsyncpa [#allocation4], 0  ;;  %s261_s12 = smov [#allocation2]   ;;  %s262_s14 = smov [#allocation5]  }
   0x3   :  { %s17_s13 = sshll.u32 %s261_s12, 4  ;;  %s26_s15 = sshll.u32 %s262_s14, 4  ;;  %s18_s13 = int_to_ptr.vmem [resolvable:$true] %s17_s13  ;;  %s289_s15 = int_to_ptr.vmem [resolvable:$true] %s26_s15 }
   0x4   :  { %s189_s18 = scalar_lea.hbm %s335_s0, 128 }
   0x5   :  { %p190_p0 = scmp.ne.s32.totalorder %s335_s0, %s189_s18  ;;  %p193_p1 = scmp.lt.u32.totalorder %s189_s18, %s335_s0 }
   0x7   :  { %p195_p2 = pnand %p193_p1, %p190_p0 }
   0x9   :  { %198 = shalt.err (!%p195_p2)
}
   0xa   :  { %s199_s23 = scalar_lea.vmem %s18_s13, 128  ;;  %p204_p4 = scmp.lt.s32.totalorder %s18_s13, %s18_s13 }
   0xb   :  { %p200_p3 = scmp.ne.s32.totalorder %s18_s13, %s199_s23  ;;  %p205_p5 = scmp.lt.s32.totalorder %s199_s23, %s199_s23 }
   0xd   :  { %p206_p6 = por %p205_p5, %p204_p4 }
   0xf   :  { %p207_p7 = pnand %p206_p6, %p200_p3 }
  0x11   :  { %210 = shalt.err (!%p207_p7)
}
  0x12   :  { %20 = dma.hbm_to_vmem [thread:$0]  %s335_s0, 128, %s18_s13, [#allocation3]  }
  0x13   :  { %s211_s28 = scalar_lea.hbm %s336_s1, 512 }
  0x14   :  { %p212_p8 = scmp.ne.s32.totalorder %s336_s1, %s211_s28  ;;  %p215_p9 = scmp.lt.u32.totalorder %s211_s28, %s336_s1 }
  0x16   :  { %p217_p10 = pnand %p215_p9, %p212_p8 }
  0x18   :  { %220 = shalt.err (!%p217_p10)
}
  0x19   :  { %s221_s6 = scalar_lea.vmem %s289_s15, 512  ;;  %p226_p12 = scmp.lt.s32.totalorder %s289_s15, %s289_s15 }
  0x1a   :  { %p222_p11 = scmp.ne.s32.totalorder %s289_s15, %s221_s6  ;;  %p227_p13 = scmp.lt.s32.totalorder %s221_s6, %s221_s6 }
  0x1c   :  { %p228_p0 = por %p227_p13, %p226_p12 }
  0x1e   :  { %p229_p1 = pnand %p228_p0, %p222_p11 }
  0x20   :  { %232 = shalt.err (!%p229_p1)
}
  0x21   :  { %s263_s0 = smov 128   ;;  %s264_s7 = smov 8  }
  0x22   :  { %32 = dma.hbm_to_vmem [thread:$0]  %s336_s1, 512, %s289_s15, [#allocation6], %s263_s0, %s263_s0, %s264_s7  }
  0x23   :  { %255 = dma.done.wait [#allocation3], 128  }
  0x24   :  { %256 = vsyncadd [#allocation3], 4294967168 }
  0x25   :  { %257 = dma.done.wait [#allocation6], 512  }
  0x26   :  { %258 = vsyncadd [#allocation6], 4294966784  ;;  %v265_v0 = vmov 0.0|0.0   ;;  %vm266_vm0 = vmmov 0   ;;  %v267_v1 = vmov 0.0   ;;  %v42_v2 = vld [vmem:[#allocation5] sm:$0xff] }
  0x27   :  { %171 = vmatprep.subr.bf16.mxu0 %v265_v0  ;;  %168 = vmatprep.mubr.msk.f32.mxu0 %vm266_vm0, %v267_v1  ;;  %v43_v3 = vld [vmem:[#allocation5 + $0x8] sm:$0xff]  ;;  %v44_v4 = vld [vmem:[#allocation5 + $0x10] sm:$0xff]  ;;  %v45_v6 = vld [vmem:[#allocation5 + $0x18] sm:$0xff]  ;;  %vm53_vm1 = vcmask 261120   ;;  %s268_s11 = smov [#allocation7]  }
  0x28   :  { %v172_v5 = vpack.c.bf16 %v43_v3, %v42_v2  ;;  %v175_v7 = vpack.c.bf16 %v45_v6, %v44_v4  ;;  %v41_v8 = vld [vmem:[#allocation2] sm:$0xff]  ;;  %s143_s12 = sshll.u32 %s268_s11, 4  ;;  %s144_s12 = int_to_ptr.vmem [resolvable:$true] %s143_s12 }
  0x29   :  { %v153_v9 = vld [vmem:[%s337_s2] ss:$0 sm:$0xff]  ;;  %s233_s13 = scalar_lea.vmem %s144_s12, 128  ;;  %p238_p3 = scmp.lt.s32.totalorder %s144_s12, %s144_s12 }
  0x2a   :  { %173 = vmatpush3.bf16.msra.mxu0 %v172_v5  ;;  %p234_p2 = scmp.ne.s32.totalorder %s144_s12, %s233_s13  ;;  %p239_p4 = scmp.lt.s32.totalorder %s233_s13, %s233_s13 }
  0x2b   :  { %174 = vmatprep.subr.bf16.mxu0 %v265_v0 }
  0x2c   :  { %p240_p5 = por %p239_p4, %p238_p3 }
  0x2e   :  { %176 = vmatpush3.bf16.msra.mxu0 %v175_v7  ;;  %p241_p6 = pnand %p240_p5, %p234_p2 }
  0x31   :  { %169 = vmatmul.mubr.msk.f32.vlgmr.msra.gmra.mrb[0].mxu0 %vm53_vm1, %v41_v8 }
 0x104   :  { %v123_v10 = vpop.f32.mrb[0].mxu0 }
 0x105   :  { %v124_v11 = vadd.f32 %v153_v9, %v123_v10  ;;  %v170_v12 = vpop.f32.mrb[1].mxu0 }
 0x107   :  { %127 = vmax.xlane.f32.xlu0 %v124_v11 }
 0x194   :  { %v128_v13 = vpop.xlane.xlu0 %127 }
 0x195   :  { %v129_v14 = vsub.f32 %v124_v11, %v128_v13 }
 0x197   :  { %v130_v15 = vmul.f32 1.442695, %v129_v14 }
 0x199   :  { %185 = vpow2.f32 %v130_v15 }
 0x1a3   :  { %v186_v16 = vpop.eup %185 }
 0x1a4   :  { %132 = vadd.xlane.f32.xlu0 %v186_v16 }
 0x231   :  { %v133_v17 = vpop.xlane.xlu0 %132 }
 0x232   :  { %187 = vrcp.f32 %v133_v17 }
 0x23c   :  { %v188_v18 = vpop.eup %187 }
 0x23d   :  { %v135_v19 = vmul.f32 %v188_v18, %v186_v16 }
 0x23f   :  { %136 = vst [vmem:[#allocation7] sm:$0xff] %v135_v19 }
 0x240   :  { %244 = shalt.err (!%p241_p6)
}
 0x241   :  { %s245_s15 = scalar_lea.hbm %s338_s3, 128 }
 0x242   :  { %p246_p7 = scmp.ne.s32.totalorder %s338_s3, %s245_s15  ;;  %p249_p8 = scmp.lt.u32.totalorder %s245_s15, %s338_s3 }
 0x244   :  { %p251_p9 = pnand %p249_p8, %p246_p7 }
 0x246   :  { %254 = shalt.err (!%p251_p9)
}
 0x247   :  { %146 = dma.vmem_to_hbm [thread:$0]  %s144_s12, 128, %s338_s3, [#allocation4]  }
 0x248   :  { %259 = dma.done.wait [#allocation4], 128  }
 0x249   :  { %260 = vsyncadd [#allocation4], 4294967168 }
 0x24a   :  { %150 = vsyncpa [#allocation3], 1 }
 0x24b   :  { %151 = vsyncpa [#allocation6], 1 }
 0x24c   :  { %152 = vsyncpa [#allocation4], 1 }

</bundles_post_ra>
